<compile_context>
chip_gen: v5e
topology: v5e:2x2
jax: 0.10.0
libtpu: 0.0.40
codegen_flags: <defaults>
</compile_context>

<pallas_src>
import math
import numpy as np
import jax
import jax.numpy as jnp
from jax.experimental import pallas as pl
from jax.experimental.pallas import tpu as pltpu


def _cosine_alphas_cumprod(num_steps: int) -> np.ndarray:
    # "cosine" noise schedule (Args.noise_schedule='cosine', diffusion_steps=4000).
    def alpha_bar(t):
        return math.cos((t + 0.008) / 1.008 * math.pi / 2) ** 2

    betas = np.array(
        [
            min(1.0 - alpha_bar((i + 1) / num_steps) / alpha_bar(i / num_steps), 0.999)
            for i in range(num_steps)
        ],
        dtype=np.float64,
    )
    alphas = 1.0 - betas
    return np.cumprod(alphas)


def make_coeff_table(alphas_cumprod: np.ndarray) -> np.ndarray:
    """(5, steps) per-timestep coefficients with the x*2-1 rescale folded in:
       xt      = tbl[0]*x + tbl[1]*noise + tbl[2]     (x is the raw [0,1] image)
       pred_x0 = clip(tbl[3]*xt - tbl[4]*eps, -1, 1)
    """
    ac = np.asarray(alphas_cumprod, dtype=np.float64)
    sqrt_ac = np.sqrt(ac)
    table = np.stack(
        [
            2.0 * sqrt_ac,              # multiplies raw x        (folds the *2)
            np.sqrt(1.0 - ac),          # multiplies noise
            -sqrt_ac,                   # additive term           (folds the -1)
            np.sqrt(1.0 / ac),
            np.sqrt(1.0 / ac - 1.0),
        ],
        axis=0,
    )
    return table.astype(np.float32)


def fused_diffusion_classifier_kernel(
    coeffs_ref,       # SMEM f32[5]: [2*sqrt_ac, sqrt_1m_ac, -sqrt_ac, sqrt(1/ac), sqrt(1/ac-1)]
    xn_ref,           # VMEM f32[2, B, C, HW]: [0] = x in [0,1], [1] = noise (one DMA)
    eps_params_ref,   # VMEM f32[C+1, C, 1]: rows 0..C-1 = w_eps[k, :] columns, row C = b_eps
    wb_cls_ref,       # VMEM f32[C+1, NCP]: rows 0..C-1 = w_cls, row C = b_cls (lane-padded)
    out_ref,          # VMEM f32[B, NCP]
):
    C = eps_params_ref.shape[1]
    B = out_ref.shape[0]
    HW = xn_ref.shape[-1]

    # Hoisted per-step scalars (each splat happens exactly once on a full block).
    a_x = coeffs_ref[0]
    a_n = coeffs_ref[1]
    a_b = coeffs_ref[2]
    sqrt_recip_ac = coeffs_ref[3]
    sqrt_recipm1_ac = coeffs_ref[4]

    x3 = xn_ref[0]                                    # (B, C, HW)
    n3 = xn_ref[1]                                    # (B, C, HW)

    # q_sample on the full block with the x*2-1 rescale folded into the coefficients.
    xt = a_x * x3 + a_n * n3 + a_b                    # (B, C, HW)

    # eps "model" (1x1 conv, eps half of learn_sigma output): full-block broadcast FMAs.
    # (B,1,HW) * (C,1) -> (B,C,HW); kept on the VPU — no MXU padding of a 3x3 mix.
    eps = xt[:, 0:1, :] * eps_params_ref[0]
    for k in range(1, C):
        eps = eps + xt[:, k:k + 1, :] * eps_params_ref[k]
    eps = eps + eps_params_ref[C]                     # per-channel bias column (C,1)

    # p_sample(...)['pred_xstart'] with clip_denoised=True, full block.
    pred_x0 = jnp.clip(sqrt_recip_ac * xt - sqrt_recipm1_ac * eps, -1.0, 1.0)

    # Global average pool: ONE cross-lane reduce over the whole block.  The diff2raw
    # (+1)*0.5 affine is linear, so it is applied after the pool on the tiny result.
    pooled = jnp.sum(pred_x0, axis=-1)                # (B, C)
    pooled_img = pooled * (0.5 / HW) + 0.5            # == mean((pred_x0 + 1) / 2)

    # Classifier head (tiny (B,C)x(C,NCP)): VPU outer-product FMAs, single lane-dense store.
    logits = wb_cls_ref[pl.ds(C, 1), :]               # bias row (1, NCP)
    for c in range(C):
        logits = logits + pooled_img[:, c:c + 1] * wb_cls_ref[pl.ds(c, 1), :]
    out_ref[...] = logits                             # one unmasked (B, 128) store


def distribution_diffusion_forward(x_nchw, t, noise_nchw,
                                   w_eps, b_eps, w_cls, b_cls,
                                   coeff_table):
    """x_nchw: (B, C, H, W) in [0,1]; t: traced int32 timestep; coeff_table: (5, steps)."""
    B, C, H, W = x_nchw.shape
    HW = H * W
    num_classes = w_cls.shape[1]
    ncp = max(128, ((num_classes + 127) // 128) * 128)   # lane-dense padded classes

    # NCHW already has H*W contiguous last -> lane-dense (B, C, HW) with a pure reshape.
    x3 = x_nchw.reshape(B, C, HW).astype(jnp.float32)
    n3 = noise_nchw.reshape(B, C, HW).astype(jnp.float32)
    xn = jnp.stack([x3, n3], axis=0)                      # (2, B, C, HW): one input DMA

    # Traced timestep -> per-step coefficients (same compiled kernel for every t).
    coeffs = coeff_table[:, t].astype(jnp.float32)        # (5,)

    # learn_sigma: only the eps half of the model output is used in this path.
    w_eps_eps = w_eps[:, :C].astype(jnp.float32)          # (C, C)   [k, c]
    b_eps_eps = b_eps[:, :C].astype(jnp.float32)          # (1, C)
    eps_params = jnp.concatenate([w_eps_eps, b_eps_eps], axis=0)[:, :, None]  # (C+1, C, 1)

    # Classifier weight + bias merged and zero-padded to 128 lanes.
    wb_cls = jnp.pad(
        jnp.concatenate([w_cls.astype(jnp.float32), b_cls.astype(jnp.float32)], axis=0),
        ((0, 0), (0, ncp - num_classes)))                 # (C+1, ncp)

    logits_padded = pl.pallas_call(
        fused_diffusion_classifier_kernel,
        out_shape=jax.ShapeDtypeStruct((B, ncp), jnp.float32),
        in_specs=[
            pl.BlockSpec(memory_space=pltpu.MemorySpace.SMEM),   # coeffs (5 scalars)
            pl.BlockSpec(memory_space=pltpu.MemorySpace.VMEM),   # x + noise, stacked
            pl.BlockSpec(memory_space=pltpu.MemorySpace.VMEM),   # eps weights + bias
            pl.BlockSpec(memory_space=pltpu.MemorySpace.VMEM),   # classifier weights + bias
        ],
        out_specs=pl.BlockSpec(memory_space=pltpu.MemorySpace.VMEM),
    )(coeffs, xn, eps_params, wb_cls)

    return logits_padded[:, :num_classes]


if __name__ == "__main__":
    # Small CIFAR-like shapes: batch=2, channels=3, spatial=16, num_classes=10.
    B, C, H, W = 2, 3, 16, 16
    NUM_CLASSES = 10
    DIFFUSION_STEPS = 4000   # Args.diffusion_steps
    T_STEP = 100             # timestep argument `t` to forward()

    key = jax.random.PRNGKey(0)
    k_x, k_noise, k_we, k_be, k_wc, k_bc = jax.random.split(key, 6)

    # Input image in [0, 1] (forward maps it to [-1, 1] via x*2-1).
    x = jax.random.uniform(k_x, (B, C, H, W), dtype=jnp.float32)
    # noise = torch.randn_like(x_start) — deterministic here.
    noise = jax.random.normal(k_noise, (B, C, H, W), dtype=jnp.float32)

    # Deterministic synthetic parameters (eps model emits 2C channels for learn_sigma;
    # only the eps half is consumed in the multistep=False path).
    w_eps = 0.1 * jax.random.normal(k_we, (C, 2 * C), dtype=jnp.float32)
    b_eps = 0.01 * jax.random.normal(k_be, (1, 2 * C), dtype=jnp.float32)
    w_cls = 0.1 * jax.random.normal(k_wc, (C, NUM_CLASSES), dtype=jnp.float32)
    b_cls = 0.01 * jax.random.normal(k_bc, (1, NUM_CLASSES), dtype=jnp.float32)

    alphas_cumprod = _cosine_alphas_cumprod(DIFFUSION_STEPS)
    coeff_table = jnp.asarray(make_coeff_table(alphas_cumprod))          # (5, 4000)

    fwd = jax.jit(distribution_diffusion_forward)
    out = fwd(x, jnp.int32(T_STEP), noise, w_eps, b_eps, w_cls, b_cls, coeff_table)
    out = jax.block_until_ready(out)

    # Pure-JAX reference of the same forward (unfused, unfolded algebra).
    a = jnp.float32(alphas_cumprod[T_STEP])
    x_in = x * 2.0 - 1.0
    x_t = jnp.sqrt(a) * x_in + jnp.sqrt(1.0 - a) * noise
    eps_ref = (jnp.einsum('bkhw,kc->bchw', x_t, w_eps[:, :C])
               + b_eps[0, :C][None, :, None, None])
    pred_ref = jnp.clip(jnp.sqrt(1.0 / a) * x_t - jnp.sqrt(1.0 / a - 1.0) * eps_ref,
                        -1.0, 1.0)
    imgs_ref = (pred_ref + 1.0) * 0.5
    logits_ref = imgs_ref.mean(axis=(2, 3)) @ w_cls + b_cls

    assert out.shape == (B, NUM_CLASSES)
    assert bool(jnp.all(jnp.isfinite(out)))
    np.testing.assert_allclose(np.asarray(out), np.asarray(logits_ref),
                               rtol=1e-4, atol=1e-4)
    print("KERNEL_OK")
</pallas_src>

<mosaic_0001>
module attributes {stable_mosaic.version = 11 : i64} {
  func.func @fused_diffusion_classifier_kernel(%arg0: memref<5xf32, #tpu.memory_space<smem>>, %arg1: memref<2x2x3x256xf32, #tpu.memory_space<vmem>>, %arg2: memref<4x3x1xf32, #tpu.memory_space<vmem>>, %arg3: memref<4x128xf32, #tpu.memory_space<vmem>>, %arg4: memref<2x128xf32, #tpu.memory_space<vmem>>) attributes {dimension_semantics = [], scalar_prefetch = 0 : i64, scratch_operands = 0 : i64, tpu.core_type = #tpu.core_type<tc>} {
    %c0 = arith.constant 0 : index
    %0 = memref.load %arg0[%c0] : memref<5xf32, #tpu.memory_space<smem>>
    %c1 = arith.constant 1 : index
    %1 = memref.load %arg0[%c1] : memref<5xf32, #tpu.memory_space<smem>>
    %c2 = arith.constant 2 : index
    %2 = memref.load %arg0[%c2] : memref<5xf32, #tpu.memory_space<smem>>
    %c3 = arith.constant 3 : index
    %3 = memref.load %arg0[%c3] : memref<5xf32, #tpu.memory_space<smem>>
    %c4 = arith.constant 4 : index
    %4 = memref.load %arg0[%c4] : memref<5xf32, #tpu.memory_space<smem>>
    %c0_0 = arith.constant 0 : index
    %c0_1 = arith.constant 0 : index
    %c0_2 = arith.constant 0 : index
    %c0_3 = arith.constant 0 : index
    %5 = vector.load %arg1[%c0_0, %c0_1, %c0_2, %c0_3] : memref<2x2x3x256xf32, #tpu.memory_space<vmem>>, vector<1x2x3x256xf32>
    %6 = vector.shape_cast %5 : vector<1x2x3x256xf32> to vector<2x3x256xf32>
    %c1_4 = arith.constant 1 : index
    %c0_5 = arith.constant 0 : index
    %c0_6 = arith.constant 0 : index
    %c0_7 = arith.constant 0 : index
    %7 = vector.load %arg1[%c1_4, %c0_5, %c0_6, %c0_7] : memref<2x2x3x256xf32, #tpu.memory_space<vmem>>, vector<1x2x3x256xf32>
    %8 = vector.shape_cast %7 : vector<1x2x3x256xf32> to vector<2x3x256xf32>
    %9 = vector.broadcast %0 : f32 to vector<2x3x256xf32>
    %10 = arith.mulf %9, %6 : vector<2x3x256xf32>
    %11 = vector.broadcast %1 : f32 to vector<2x3x256xf32>
    %12 = arith.mulf %11, %8 : vector<2x3x256xf32>
    %13 = arith.addf %10, %12 : vector<2x3x256xf32>
    %14 = vector.broadcast %2 : f32 to vector<2x3x256xf32>
    %15 = arith.addf %13, %14 : vector<2x3x256xf32>
    %16 = vector.extract_strided_slice %15 {offsets = [0, 0, 0], sizes = [2, 1, 256], strides = [1, 1, 1]} : vector<2x3x256xf32> to vector<2x1x256xf32>
    %c0_8 = arith.constant 0 : index
    %c0_9 = arith.constant 0 : index
    %c0_10 = arith.constant 0 : index
    %17 = vector.load %arg2[%c0_8, %c0_9, %c0_10] : memref<4x3x1xf32, #tpu.memory_space<vmem>>, vector<1x3x1xf32>
    %18 = vector.shape_cast %17 : vector<1x3x1xf32> to vector<3x1xf32>
    %19 = vector.shape_cast %18 : vector<3x1xf32> to vector<1x3x1xf32>
    %20 = vector.broadcast %16 : vector<2x1x256xf32> to vector<2x3x256xf32>
    %21 = vector.broadcast %19 : vector<1x3x1xf32> to vector<2x3x256xf32>
    %22 = arith.mulf %20, %21 : vector<2x3x256xf32>
    %23 = vector.extract_strided_slice %15 {offsets = [0, 1, 0], sizes = [2, 1, 256], strides = [1, 1, 1]} : vector<2x3x256xf32> to vector<2x1x256xf32>
    %c1_11 = arith.constant 1 : index
    %c0_12 = arith.constant 0 : index
    %c0_13 = arith.constant 0 : index
    %24 = vector.load %arg2[%c1_11, %c0_12, %c0_13] : memref<4x3x1xf32, #tpu.memory_space<vmem>>, vector<1x3x1xf32>
    %25 = vector.shape_cast %24 : vector<1x3x1xf32> to vector<3x1xf32>
    %26 = vector.shape_cast %25 : vector<3x1xf32> to vector<1x3x1xf32>
    %27 = vector.broadcast %23 : vector<2x1x256xf32> to vector<2x3x256xf32>
    %28 = vector.broadcast %26 : vector<1x3x1xf32> to vector<2x3x256xf32>
    %29 = arith.mulf %27, %28 : vector<2x3x256xf32>
    %30 = arith.addf %22, %29 : vector<2x3x256xf32>
    %31 = vector.extract_strided_slice %15 {offsets = [0, 2, 0], sizes = [2, 1, 256], strides = [1, 1, 1]} : vector<2x3x256xf32> to vector<2x1x256xf32>
    %c2_14 = arith.constant 2 : index
    %c0_15 = arith.constant 0 : index
    %c0_16 = arith.constant 0 : index
    %32 = vector.load %arg2[%c2_14, %c0_15, %c0_16] : memref<4x3x1xf32, #tpu.memory_space<vmem>>, vector<1x3x1xf32>
    %33 = vector.shape_cast %32 : vector<1x3x1xf32> to vector<3x1xf32>
    %34 = vector.shape_cast %33 : vector<3x1xf32> to vector<1x3x1xf32>
    %35 = vector.broadcast %31 : vector<2x1x256xf32> to vector<2x3x256xf32>
    %36 = vector.broadcast %34 : vector<1x3x1xf32> to vector<2x3x256xf32>
    %37 = arith.mulf %35, %36 : vector<2x3x256xf32>
    %38 = arith.addf %30, %37 : vector<2x3x256xf32>
    %c3_17 = arith.constant 3 : index
    %c0_18 = arith.constant 0 : index
    %c0_19 = arith.constant 0 : index
    %39 = vector.load %arg2[%c3_17, %c0_18, %c0_19] : memref<4x3x1xf32, #tpu.memory_space<vmem>>, vector<1x3x1xf32>
    %40 = vector.shape_cast %39 : vector<1x3x1xf32> to vector<3x1xf32>
    %41 = vector.shape_cast %40 : vector<3x1xf32> to vector<1x3x1xf32>
    %42 = vector.broadcast %41 : vector<1x3x1xf32> to vector<2x3x256xf32>
    %43 = arith.addf %38, %42 : vector<2x3x256xf32>
    %44 = vector.broadcast %3 : f32 to vector<2x3x256xf32>
    %45 = arith.mulf %44, %15 : vector<2x3x256xf32>
    %46 = vector.broadcast %4 : f32 to vector<2x3x256xf32>
    %47 = arith.mulf %46, %43 : vector<2x3x256xf32>
    %48 = arith.subf %45, %47 : vector<2x3x256xf32>
    %cst = arith.constant -1.000000e+00 : f32
    %cst_20 = arith.constant 1.000000e+00 : f32
    %49 = vector.broadcast %cst : f32 to vector<2x3x256xf32>
    %50 = arith.maximumf %49, %48 : vector<2x3x256xf32>
    %51 = vector.broadcast %cst_20 : f32 to vector<2x3x256xf32>
    %52 = arith.minimumf %51, %50 : vector<2x3x256xf32>
    %cst_21 = arith.constant dense<0.000000e+00> : vector<2x3xf32>
    %53 = vector.multi_reduction <add>, %52, %cst_21 [2] : vector<2x3x256xf32> to vector<2x3xf32>
    %cst_22 = arith.constant 0.001953125 : f32
    %54 = vector.broadcast %cst_22 : f32 to vector<2x3xf32>
    %55 = arith.mulf %53, %54 : vector<2x3xf32>
    %cst_23 = arith.constant 5.000000e-01 : f32
    %56 = vector.broadcast %cst_23 : f32 to vector<2x3xf32>
    %57 = arith.addf %55, %56 : vector<2x3xf32>
    %c3_24 = arith.constant 3 : index
    %c0_25 = arith.constant 0 : index
    %58 = vector.load %arg3[%c3_24, %c0_25] : memref<4x128xf32, #tpu.memory_space<vmem>>, vector<1x128xf32>
    %59 = vector.extract_strided_slice %57 {offsets = [0, 0], sizes = [2, 1], strides = [1, 1]} : vector<2x3xf32> to vector<2x1xf32>
    %c0_26 = arith.constant 0 : index
    %c0_27 = arith.constant 0 : index
    %60 = vector.load %arg3[%c0_26, %c0_27] : memref<4x128xf32, #tpu.memory_space<vmem>>, vector<1x128xf32>
    %61 = vector.broadcast %59 : vector<2x1xf32> to vector<2x128xf32>
    %62 = vector.broadcast %60 : vector<1x128xf32> to vector<2x128xf32>
    %63 = arith.mulf %61, %62 : vector<2x128xf32>
    %64 = vector.broadcast %58 : vector<1x128xf32> to vector<2x128xf32>
    %65 = arith.addf %64, %63 : vector<2x128xf32>
    %66 = vector.extract_strided_slice %57 {offsets = [0, 1], sizes = [2, 1], strides = [1, 1]} : vector<2x3xf32> to vector<2x1xf32>
    %c1_28 = arith.constant 1 : index
    %c0_29 = arith.constant 0 : index
    %67 = vector.load %arg3[%c1_28, %c0_29] : memref<4x128xf32, #tpu.memory_space<vmem>>, vector<1x128xf32>
    %68 = vector.broadcast %66 : vector<2x1xf32> to vector<2x128xf32>
    %69 = vector.broadcast %67 : vector<1x128xf32> to vector<2x128xf32>
    %70 = arith.mulf %68, %69 : vector<2x128xf32>
    %71 = arith.addf %65, %70 : vector<2x128xf32>
    %72 = vector.extract_strided_slice %57 {offsets = [0, 2], sizes = [2, 1], strides = [1, 1]} : vector<2x3xf32> to vector<2x1xf32>
    %c2_30 = arith.constant 2 : index
    %c0_31 = arith.constant 0 : index
    %73 = vector.load %arg3[%c2_30, %c0_31] : memref<4x128xf32, #tpu.memory_space<vmem>>, vector<1x128xf32>
    %74 = vector.broadcast %72 : vector<2x1xf32> to vector<2x128xf32>
    %75 = vector.broadcast %73 : vector<1x128xf32> to vector<2x128xf32>
    %76 = arith.mulf %74, %75 : vector<2x128xf32>
    %77 = arith.addf %71, %76 : vector<2x128xf32>
    %c0_32 = arith.constant 0 : index
    %c0_33 = arith.constant 0 : index
    %78 = vector.load %arg4[%c0_32, %c0_33] : memref<2x128xf32, #tpu.memory_space<vmem>>, vector<2x128xf32>
    tpu.vector_store %arg4[%c0_32, %c0_33], %77 {strides = array<i32>} : memref<2x128xf32, #tpu.memory_space<vmem>>, vector<2x128xf32>,
    return
  }
}

</mosaic_0001>

<bundles_post_ra>
// kernel: distribution_diffusion_forward.1
= control target key start
LH: loop header
LB: loop body
LE: loop exit
PB: predicated region body
PF: predicated region fallthrough
CT: control target
= control target key end

     0   :  { %9 = vsyncpa [#allocation4], 0  ;;  %s2111_s0 = inlined_call_operand.vmem [shape: f32[5], index: 0, kind: input, shape index: {}]   ;;  %s2112_s1 = inlined_call_operand.vmem [shape: f32[2,2,3,256], index: 1, kind: input, shape index: {}]   ;;  %s2113_s2 = inlined_call_operand.vmem [shape: f32[4,3,1], index: 2, kind: input, shape index: {}]   ;;  %s2114_s3 = inlined_call_operand.vmem [shape: f32[4,128], index: 3, kind: input, shape index: {}]   ;;  %s2115_s4 = inlined_call_operand.hbm [shape: f32[2,128], index: 4, kind: output, shape index: {}]  }
   0x1   :  { %10 = vsyncpa [#allocation3], 0  ;;  %s16_s17 = sshll.u32 %s2111_s0, 4  ;;  %s1386_s18 = smov [#allocation2]   ;;  %s17_s17 = int_to_ptr.vmem [resolvable:$true] %s16_s17 }
   0x2   :  { %19 = dma.vmem_to_smem %s17_s17, 16, %s1386_s18, [#allocation4]  }
   0x3   :  { %1382 = dma.done.wait [#allocation4], 16  }
   0x4   :  { %1383 = vsyncadd [#allocation4], 4294967280 }
   0x5   :  { %30 = sfence }
   0x6   :  { %v1280_v0 = vld [vmem:[%s2113_s2 + $0x8] sm:$0x7]  ;;  %v2118_v1 = vlaneseq  ;;  %v2116_v2 = vmov 0   ;;  %v1281_v5 = vld [vmem:[%s2113_s2 + $0xc] sm:$0x7]  ;;  %s31_s29 = sld [smem:[#allocation2]] }
   0x7   :  { %1288 = vset.pattern.permute.xlu1 %v2116_v2  ;;  %1287 = vset.pattern.permute.xlu0 %v2116_v2  ;;  %v1342_v6 = vld [vmem:[%s2114_s3] ss:$0 sm:$0xff]  ;;  %v1279_v10 = vld [vmem:[%s2113_s2 + $0x4] sm:$0x7]  ;;  %v1494_v21 = vld [vmem:[%s2114_s3 + $0x1] ss:$0 sm:$0xff] }
   0x8   :  { %119 = vperm.xlu1 %1288, %v1280_v0   ;;  %v1423_v3 = vshrl.u32 %v2118_v1, 7  ;;  %v52_v9 = vld [vmem:[%s2113_s2] sm:$0x7]  ;;  %s1273_s30 = sld [smem:[#allocation2 + $0x1]]  ;;  %v37_v25 = vld [vmem:[%s2112_s1 + $0x8] sm:$0x77] }
   0x9   :  { %69 = vperm.xlu0 %1287, %v52_v9   ;;  %s1274_s5 = sld [smem:[#allocation2 + $0x2]]  ;;  %v36_v24 = vld [vmem:[%s2112_s1] sm:$0x77]  ;;  %v1277_v26 = vld [vmem:[%s2112_s1 + $0x10] sm:$0x77]  ;;  %vm155_vm0 = vcmask 1043456  }
   0xa   :  { %v1426_v4 = vadd.s32 16, %v1423_v3  ;;  %v1436_v7 = vadd.s32 8, %v1423_v3  ;;  %v1440_v8 = vadd.s32 56, %v1423_v3  ;;  %v1450_v11 = vadd.s32 24, %v1423_v3  ;;  %v1278_v28 = vld [vmem:[%s2112_s1 + $0x18] sm:$0x77] }
   0xb   :  { %v1454_v12 = vadd.s32 80, %v1423_v3  ;;  %v1459_v13 = vadd.s32 40, %v1423_v3  ;;  %v1463_v14 = vadd.s32 96, %v1423_v3  ;;  %v1466_v15 = vadd.s32 32, %v1423_v3  ;;  %s1548_s1 = sld [smem:[#allocation2 + $0x3]]  ;;  %s1263_s21 = sshll.u32 %s2115_s4, 4  ;;  %s1264_s21 = int_to_ptr.hbm [resolvable:$true] %s1263_s21 }
   0xc   :  { %1291 = vset.pattern.permute.xlu2 %v1426_v4  ;;  %v1471_v16 = vadd.s32 48, %v1423_v3  ;;  %v1475_v17 = vadd.s32 120, %v1423_v3  ;;  %v1478_v18 = vadd.s32 64, %v1423_v3  ;;  %v1483_v19 = vadd.s32 72, %v1423_v3  ;;  %s1276_s14 = sld [smem:[#allocation2 + $0x4]] }
   0xd   :  { %v1487_v20 = vadd.s32 104, %v1423_v3  ;;  %v1498_v22 = vadd.s32 88, %v1423_v3  ;;  %v1505_v23 = vadd.s32 112, %v1423_v3  ;;  %v41_v27 = vstv %s31_s29 }
   0xe   :  { %2124 = vst [vmem:[#allocation8_spill] sm:$0xff] %v1475_v17  ;;  %v42_v29 = vmul.f32 %v41_v27, %v36_v24  ;;  %v43_v30 = vmul.f32 %v41_v27, %v37_v25  ;;  %v44_v31 = vstv %s1273_s30  ;;  %vm179_vm1 = vcmask 1042432  }
   0xf   :  { %v45_v32 = vmul.f32 %v1277_v26, %v44_v31  ;;  %v46_v33 = vmul.f32 %v1278_v28, %v44_v31  ;;  %v49_v34 = vstv %s1274_s5  ;;  %vm478_vm2 = vcmask 130112  }
  0x10   :  { %134 = vperm.xlu1 %1288, %v1281_v5   ;;  %vm482_vm3 = vcmask 195712   ;;  %vm486_vm4 = vcmask 261312   ;;  %vm490_vm5 = vcmask 326912   ;;  %vm494_vm6 = vcmask 392512  }
  0x11   :  { %92 = vperm.xlu0 %1287, %v1279_v10   ;;  %v47_v35 = vadd.f32 %v45_v32, %v42_v29  ;;  %v48_v36 = vadd.f32 %v46_v33, %v43_v30  ;;  %vm498_vm7 = vcmask 458112   ;;  %vm502_vm8 = vcmask 523712  }
  0x12   :  { %vm506_vm9 = vcmask 589312   ;;  %vm510_vm10 = vcmask 654912   ;;  %vm514_vm11 = vcmask 720512   ;;  %vm518_vm12 = vcmask 786112  }
  0x13   :  { %v1529_v38 = vadd.f32 %v49_v34, %v47_v35  ;;  %v1531_v39 = vadd.f32 %v49_v34, %v48_v36  ;;  %vm522_vm13 = vcmask 851712   ;;  %vm526_vm14 = vcmask 917312  }
  0x14   :  { %216 = vperm.xlu2 %1291, %v1342_v6   ;;  %vm530_vm15 = vcmask 982912  }
  0x15   :  { %v55_v40 = vperm.slane %v1529_v38, 0  ;;  %v56_v41 = vperm.slane %v1529_v38, 4  ;;  %v57_v42 = vperm.slane %v1531_v39, 0  ;;  %v58_v43 = vperm.slane %v1531_v39, 4 }
  0x16   :  { %v105_v44 = vperm.slane %v1529_v38, 2  ;;  %v106_v45 = vperm.slane %v1529_v38, 6  ;;  %v107_v46 = vperm.slane %v1531_v39, 2  ;;  %v108_v47 = vperm.slane %v1531_v39, 6 }
  0x17   :  { %v63_v48 = vperm.slane %v55_v40, 0  ;;  %v64_v49 = vperm.slane %v56_v41, 0  ;;  %v65_v50 = vperm.slane %v57_v42, 0  ;;  %v66_v51 = vperm.slane %v58_v43, 0 }
  0x18   :  { %1290 = vset.pattern.permute.xlu1 %v1436_v7  ;;  %v113_v53 = vperm.slane %v105_v44, 2  ;;  %v114_v54 = vperm.slane %v106_v45, 2  ;;  %v115_v55 = vperm.slane %v107_v46, 2  ;;  %v116_v56 = vperm.slane %v108_v47, 2 }
  0x19   :  { %1289 = vset.pattern.permute.xlu0 %v1423_v3  ;;  %v78_v57 = vperm.slane %v1529_v38, 1  ;;  %v79_v58 = vperm.slane %v1529_v38, 5  ;;  %v80_v59 = vperm.slane %v1531_v39, 1  ;;  %v81_v60 = vperm.slane %v1531_v39, 5 }
  0x1a   :  { %v141_v44 = vstv %s1548_s1  ;;  %v144_v45 = vstv %s1276_s14 }
  0x1b   :  { %v87_v9 = vperm.slane %v79_v58, 1  ;;  %v88_v10 = vperm.slane %v80_v59, 1  ;;  %v89_v24 = vperm.slane %v81_v60, 1 }
  0x1c   :  { %1296 = vset.pattern.permute.xlu2 %v1440_v8 }
  0x20   :  { %210 = vperm.xlu1 %1290, %v1342_v6  }
  0x21   :  { %204 = vperm.xlu0 %1289, %v1342_v6  }
  0x24   :  { %246 = vperm.xlu2 %1296, %v1342_v6  }
  0x28   :  { %1292 = vset.pattern.permute.xlu1 %v1450_v11 }
  0x29   :  { %1293 = vset.pattern.permute.xlu0 %v1466_v15 }
  0x2c   :  { %1299 = vset.pattern.permute.xlu2 %v1454_v12 }
  0x30   :  { %222 = vperm.xlu1 %1292, %v1342_v6  }
  0x31   :  { %228 = vperm.xlu0 %1293, %v1342_v6  }
  0x34   :  { %264 = vperm.xlu2 %1299, %v1342_v6  }
  0x38   :  { %1294 = vset.pattern.permute.xlu1 %v1459_v13 }
  0x39   :  { %1297 = vset.pattern.permute.xlu0 %v1478_v18 }
  0x3c   :  { %1301 = vset.pattern.permute.xlu2 %v1463_v14 }
  0x40   :  { %234 = vperm.xlu1 %1294, %v1342_v6  }
  0x41   :  { %252 = vperm.xlu0 %1297, %v1342_v6  }
  0x44   :  { %276 = vperm.xlu2 %1301, %v1342_v6  }
  0x48   :  { %1295 = vset.pattern.permute.xlu1 %v1471_v16 }
  0x49   :  { %1302 = vset.pattern.permute.xlu0 %v1487_v20 }
  0x4c   :  { %1304 = vset.pattern.permute.xlu2 %v1475_v17 }
  0x50   :  { %240 = vperm.xlu1 %1295, %v1342_v6  }
  0x51   :  { %282 = vperm.xlu0 %1302, %v1342_v6  }
  0x54   :  { %294 = vperm.xlu2 %1304, %v1342_v6  }
  0x58   :  { %1298 = vset.pattern.permute.xlu1 %v1483_v19 }
  0x59   :  { %1307 = vset.pattern.permute.xlu0 %v1426_v4 }
  0x5c   :  { %1306 = vset.pattern.permute.xlu2 %v1436_v7 }
  0x60   :  { %258 = vperm.xlu1 %1298, %v1342_v6  }
  0x61   :  { %592 = vperm.xlu0 %1307, %v1494_v21  }
  0x64   :  { %586 = vperm.xlu2 %1306, %v1494_v21  }
  0x68   :  { %1300 = vset.pattern.permute.xlu1 %v1498_v22 }
  0x69   :  { %1312 = vset.pattern.permute.xlu0 %v1440_v8 }
  0x6c   :  { %1309 = vset.pattern.permute.xlu2 %v1466_v15 }
  0x70   :  { %270 = vperm.xlu1 %1300, %v1342_v6  }
  0x71   :  { %622 = vperm.xlu0 %1312, %v1494_v21  }
  0x74   :  { %604 = vperm.xlu2 %1309, %v1494_v21  }
  0x78   :  { %1303 = vset.pattern.permute.xlu1 %v1505_v23 }
  0x79   :  { %1317 = vset.pattern.permute.xlu0 %v1463_v14 }
  0x7a   :  { %v120_v52 = vpop.permute.xlu1 %119 }
  0x7b   :  { %v70_v37 = vpop.permute.xlu0 %69  ;;  %v122_v25 = vmul.f32 %v120_v52, %v113_v53  ;;  %v123_v26 = vmul.f32 %v120_v52, %v114_v54  ;;  %v124_v27 = vmul.f32 %v120_v52, %v115_v55  ;;  %v125_v28 = vmul.f32 %v120_v52, %v116_v56 }
  0x7c   :  { %1311 = vset.pattern.permute.xlu2 %v1471_v16  ;;  %v72_v61 = vmul.f32 %v70_v37, %v63_v48  ;;  %v73_v62 = vmul.f32 %v70_v37, %v64_v49  ;;  %v74_v63 = vmul.f32 %v70_v37, %v65_v50  ;;  %v75_v0 = vmul.f32 %v70_v37, %v66_v51 }
  0x7d   :  { %v142_v54 = vmul.f32 %v141_v44, %v1529_v38  ;;  %v143_v55 = vmul.f32 %v141_v44, %v1531_v39 }
  0x80   :  { %288 = vperm.xlu1 %1303, %v1342_v6   ;;  %v86_v6 = vperm.slane %v78_v57, 1 }
  0x81   :  { %652 = vperm.xlu0 %1317, %v1494_v21  }
  0x82   :  { %v135_v37 = vpop.permute.xlu1 %134 }
  0x83   :  { %v93_v5 = vpop.permute.xlu0 %92 }
  0x84   :  { %616 = vperm.xlu2 %1311, %v1494_v21   ;;  %v95_v29 = vmul.f32 %v93_v5, %v86_v6  ;;  %v96_v30 = vmul.f32 %v93_v5, %v87_v9  ;;  %v97_v31 = vmul.f32 %v93_v5, %v88_v10  ;;  %v98_v32 = vmul.f32 %v93_v5, %v89_v24 }
  0x86   :  { %v99_v33 = vadd.f32 %v95_v29, %v72_v61  ;;  %v100_v34 = vadd.f32 %v96_v30, %v73_v62  ;;  %v101_v35 = vadd.f32 %v97_v31, %v74_v63  ;;  %v102_v36 = vadd.f32 %v98_v32, %v75_v0 }
  0x88   :  { %1305 = vset.pattern.permute.xlu1 %v1423_v3  ;;  %v126_v40 = vadd.f32 %v122_v25, %v99_v33  ;;  %v127_v41 = vadd.f32 %v123_v26, %v100_v34  ;;  %v128_v42 = vadd.f32 %v124_v27, %v101_v35  ;;  %v129_v43 = vadd.f32 %v125_v28, %v102_v36  ;;  %v1583_v26 = vpop.permute.xlu2 %216 }
  0x89   :  { %1324 = vset.pattern.permute.xlu0 %v1436_v7  ;;  %v1556_v7 = vld [vmem:[%s2114_s3 + $0x2] ss:$0 sm:$0xff] }
  0x8a   :  { %v137_v46 = vadd.f32 %v135_v37, %v126_v40  ;;  %v138_v47 = vadd.f32 %v135_v37, %v127_v41  ;;  %v139_v48 = vadd.f32 %v135_v37, %v128_v42  ;;  %v140_v49 = vadd.f32 %v135_v37, %v129_v43 }
  0x8c   :  { %1314 = vset.pattern.permute.xlu2 %v1483_v19  ;;  %v145_v50 = vmul.f32 %v144_v45, %v137_v46  ;;  %v146_v51 = vmul.f32 %v144_v45, %v138_v47  ;;  %v147_v52 = vmul.f32 %v144_v45, %v139_v48  ;;  %v148_v53 = vmul.f32 %v144_v45, %v140_v49 }
  0x8e   :  { %v153_v56 = vrot.slane %v146_v51, 4  ;;  %v154_v57 = vrot.slane %v148_v53, 4 }
  0x90   :  { %580 = vperm.xlu1 %1305, %v1494_v21   ;;  %v156_v58 = vsel %vm155_vm0, %v145_v50, %v153_v56  ;;  %v157_v59 = vsel %vm155_vm0, %v147_v52, %v154_v57  ;;  %v1588_v28 = vpop.permute.xlu2 %246  ;;  %vm534_vm0 = vcmask 1048512  }
  0x91   :  { %928 = vperm.xlu0 %1324, %v1556_v7   ;;  %v160_v60 = vsub.f32 %v142_v54, %v156_v58  ;;  %v161_v61 = vsub.f32 %v143_v55, %v157_v59 }
  0x92   :  { %v1581_v25 = vpop.permute.xlu1 %210 }
  0x93   :  { %v1282_v62 = vclamps-f32 %v160_v60, 1.0  ;;  %v1283_v63 = vclamps-f32 %v161_v61, 1.0  ;;  %v1602_v34 = vpop.permute.xlu0 %204 }
  0x94   :  { %634 = vperm.xlu2 %1314, %v1494_v21  }
  0x95   :  { %168 = vst [vmem:[#allocation1] ss:$2 sm:$0xff] %v1282_v62 }
  0x96   :  { %172 = vst [vmem:[#allocation1 + $0x10] ss:$2 sm:$0xff] %v1283_v63 }
  0x98   :  { %1308 = vset.pattern.permute.xlu1 %v1450_v11  ;;  %v1592_v30 = vpop.permute.xlu2 %264 }
  0x99   :  { %1329 = vset.pattern.permute.xlu0 %v1471_v16 }
  0x9c   :  { %1316 = vset.pattern.permute.xlu2 %v1498_v22  ;;  %v169_v16 = vld.sshfl [vmem:[#allocation1] sm:$0xff pattern:$0x75316420]  ;;  %v170_v38 = vld.sshfl [vmem:[#allocation1 + $0x8] sm:$0xff pattern:$0x75316420] }
  0x9d   :  { %v180_v39 = vsel %vm179_vm1, %v169_v16, 0.0  ;;  %v181_v0 = vsel %vm179_vm1, %v170_v38, 0.0  ;;  %v174_v6 = vld.sshfl [vmem:[#allocation1 + $0x18] sm:$0xff pattern:$0x75316420] }
  0x9e   :  { %v182_v5 = vadd.f32 %v181_v0, %v180_v39  ;;  %v186_v10 = vsel %vm179_vm1, %v174_v6, 0.0 }
  0xa0   :  { %598 = vperm.xlu1 %1308, %v1494_v21   ;;  %v1596_v32 = vpop.permute.xlu2 %276 }
  0xa1   :  { %958 = vperm.xlu0 %1329, %v1556_v7  }
  0xa2   :  { %v1586_v27 = vpop.permute.xlu1 %222 }
  0xa3   :  { %v1608_v37 = vpop.permute.xlu0 %228 }
  0xa4   :  { %646 = vperm.xlu2 %1316, %v1494_v21  }
  0xa8   :  { %1310 = vset.pattern.permute.xlu1 %v1459_v13 }
  0xa9   :  { %1334 = vset.pattern.permute.xlu0 %v1498_v22  ;;  %v173_v22 = vld.sshfl [vmem:[#allocation1 + $0x10] sm:$0xff pattern:$0x75316420] }
  0xaa   :  { %v185_v9 = vsel %vm179_vm1, %v173_v22, 0.0  ;;  %vm567_vm1 = vcmask 1041409  }
  0xab   :  { %v187_v24 = vadd.f32 %v186_v10, %v185_v9 }
  0xac   :  { %1319 = vset.pattern.permute.xlu2 %v1505_v23 }
  0xb0   :  { %610 = vperm.xlu1 %1310, %v1494_v21  }
  0xb1   :  { %988 = vperm.xlu0 %1334, %v1556_v7  }
  0xb2   :  { %v1590_v29 = vpop.permute.xlu1 %234 }
  0xb3   :  { %v1614_v42 = vpop.permute.xlu0 %252 }
  0xb4   :  { %664 = vperm.xlu2 %1319, %v1494_v21  }
  0xb8   :  { %1313 = vset.pattern.permute.xlu1 %v1478_v18 }
  0xb9   :  { %1335 = vset.pattern.permute.xlu0 %v2116_v2 }
  0xbc   :  { %1322 = vset.pattern.permute.xlu2 %v2116_v2 }
  0xc0   :  { %628 = vperm.xlu1 %1313, %v1494_v21  }
  0xc2   :  { %v1594_v31 = vpop.permute.xlu1 %240 }
  0xc3   :  { %v1620_v45 = vpop.permute.xlu0 %282 }
  0xc8   :  { %1315 = vset.pattern.permute.xlu1 %v1454_v12 }
  0xd0   :  { %640 = vperm.xlu1 %1315, %v1494_v21  }
  0xd2   :  { %v1598_v33 = vpop.permute.xlu1 %258 }
  0xd3   :  { %v1628_v49 = vpop.permute.xlu0 %592 }
  0xd8   :  { %1318 = vset.pattern.permute.xlu1 %v1487_v20 }
  0xdd   :  { %183 = vadd.xlane.f32.xlu2 %v182_v5 }
  0xe0   :  { %658 = vperm.xlu1 %1318, %v1494_v21  }
  0xe2   :  { %v1606_v36 = vpop.permute.xlu1 %270 }
  0xe3   :  { %v1632_v52 = vpop.permute.xlu0 %622 }
  0xe5   :  { %188 = vadd.xlane.f32.xlu2 %v187_v24 }
  0xe8   :  { %1320 = vset.pattern.permute.xlu1 %v1475_v17 }
  0xf0   :  { %670 = vperm.xlu1 %1320, %v1494_v21   ;;  %v1600_v21 = vpop.permute.xlu2 %294 }
  0xf2   :  { %v1612_v41 = vpop.permute.xlu1 %288 }
  0xf3   :  { %v1638_v57 = vpop.permute.xlu0 %652 }
  0xf8   :  { %1321 = vset.pattern.permute.xlu1 %v2116_v2  ;;  %v1604_v35 = vpop.permute.xlu2 %586 }
 0x100   :  { %v1610_v40 = vpop.permute.xlu2 %604 }
 0x102   :  { %v1618_v44 = vpop.permute.xlu1 %580 }
 0x103   :  { %v1646_v39 = vpop.permute.xlu0 %928 }
 0x108   :  { %v1616_v43 = vpop.permute.xlu2 %616 }
 0x110   :  { %v1622_v46 = vpop.permute.xlu2 %634 }
 0x112   :  { %v1624_v47 = vpop.permute.xlu1 %598 }
 0x118   :  { %v1626_v48 = vpop.permute.xlu2 %646 }
 0x120   :  { %v665_v50 = vpop.permute.xlu2 %664 }
 0x122   :  { %v1630_v51 = vpop.permute.xlu1 %610 }
 0x132   :  { %v1634_v55 = vpop.permute.xlu1 %628 }
 0x142   :  { %v1644_v16 = vpop.permute.xlu1 %640 }
 0x150   :  { %v184_v53 = vpop.xlane.xlu2 %183 }
 0x151   :  { %v190_v54 = vmul.f32 0.001953125, %v184_v53 }
 0x153   :  { %v1636_v56 = vadd.f32 0.5, %v190_v54 }
 0x155   :  { %2125 = vst [vmem:[#allocation9_spill] sm:$0xff] %v1636_v56  ;;  %v196_v58 = vperm.slane %v1636_v56, 0  ;;  %v1652_v6 = vperm.slane %v1636_v56, 1 }
 0x157   :  { %v314_v59 = vmul.f32 %v1583_v26, %v196_v58  ;;  %v313_v60 = vmul.f32 %v1581_v25, %v196_v58  ;;  %v312_v62 = vmul.f32 %v1602_v34, %v196_v58  ;;  %v319_v0 = vmul.f32 %v1588_v28, %v196_v58 }
 0x158   :  { %v189_v61 = vpop.xlane.xlu2 %188  ;;  %v316_v5 = vmul.f32 %v1608_v37, %v196_v58  ;;  %v315_v22 = vmul.f32 %v1586_v27, %v196_v58  ;;  %v1659_v24 = vmul.f32 %v665_v50, %v1652_v6  ;;  %v325_v1 = vmul.f32 %v1620_v45, %v196_v58 }
 0x159   :  { %v191_v63 = vmul.f32 0.001953125, %v189_v61  ;;  %384 = vperm.xlu0 %1335, %v314_v59   ;;  %381 = vperm.xlu2 %1322, %v313_v60   ;;  %v1669_v59 = vpop.permute.xlu1 %658  ;;  %v322_v60 = vmul.f32 %v1592_v30, %v196_v58  ;;  %v318_v61 = vmul.f32 %v1594_v31, %v196_v58  ;;  %v321_v17 = vmul.f32 %v1598_v33, %v196_v58 }
 0x15a   :  { %378 = vperm.xlu1 %1321, %v312_v62   ;;  %v320_v56 = vmul.f32 %v1614_v42, %v196_v58 }
 0x15b   :  { %v193_v38 = vadd.f32 0.5, %v191_v63  ;;  %v1676_v63 = vpop.permute.xlu0 %958 }
 0x15c   :  { %2127 = vst [vmem:[#allocation11_spill] sm:$0xff] %v1676_v63 }
 0x15d   :  { %v1654_v9 = vperm.slane %v193_v38, 1  ;;  %v1656_v10 = vperm.slane %v193_v38, 2 }
 0x15f   :  { %2126 = vst [vmem:[#allocation10_spill] sm:$0xff] %v1656_v10  ;;  %v1663_v53 = vmul.f32 %v1618_v44, %v1654_v9  ;;  %v1667_v54 = vmul.f32 %v1624_v47, %v1654_v9  ;;  %v1674_v62 = vmul.f32 %v665_v50, %v1654_v9  ;;  %v1689_v2 = vmul.f32 %v1676_v63, %v1656_v10 }
 0x160   :  { %v1693_v50 = vmul.f32 %v1646_v39, %v1656_v10  ;;  %v326_v10 = vmul.f32 %v1612_v41, %v196_v58 }
 0x161   :  { %399 = vperm.xlu0 %1335, %v319_v0   ;;  %390 = vperm.xlu2 %1322, %v316_v5   ;;  %v317_v0 = vmul.f32 %v1590_v29, %v196_v58  ;;  %v1681_v5 = vmul.f32 %v1644_v16, %v1654_v9  ;;  %2128 = vst [vmem:[#allocation12_spill] sm:$0xff] %v1689_v2 }
 0x162   :  { %387 = vperm.xlu1 %1321, %v315_v22   ;;  %v1685_v22 = vmul.f32 %v1669_v59, %v1654_v9  ;;  %2129 = vst [vmem:[#allocation13_spill] sm:$0xff] %v1693_v50  ;;  %v323_v2 = vmul.f32 %v1606_v36, %v196_v58 }
 0x169   :  { %408 = vperm.xlu0 %1335, %v322_v60   ;;  %396 = vperm.xlu2 %1322, %v318_v61   ;;  %v197_v60 = vperm.slane %v193_v38, 0  ;;  %v324_v61 = vmul.f32 %v1596_v32, %v196_v58 }
 0x16a   :  { %393 = vperm.xlu1 %1321, %v317_v0   ;;  %v327_v0 = vmul.f32 %v1600_v21, %v196_v58 }
 0x16b   :  { %v328_v63 = vmul.f32 %v1602_v34, %v197_v60  ;;  %v331_v50 = vmul.f32 %v1586_v27, %v197_v60  ;;  %v329_v34 = vmul.f32 %v1581_v25, %v197_v60  ;;  %v332_v27 = vmul.f32 %v1608_v37, %v197_v60 }
 0x16c   :  { %v336_v58 = vmul.f32 %v1614_v42, %v197_v60  ;;  %v339_v25 = vmul.f32 %v1606_v36, %v197_v60  ;;  %v342_v37 = vmul.f32 %v1612_v41, %v197_v60  ;;  %v689_v42 = vmul.f32 %v1604_v35, %v1652_v6 }
 0x16d   :  { %v690_v36 = vmul.f32 %v1628_v49, %v1652_v6 }
 0x171   :  { %417 = vperm.xlu0 %1335, %v325_v1   ;;  %405 = vperm.xlu2 %1322, %v321_v17   ;;  %v330_v1 = vmul.f32 %v1583_v26, %v197_v60  ;;  %v334_v17 = vmul.f32 %v1594_v31, %v197_v60  ;;  %v340_v26 = vmul.f32 %v1596_v32, %v197_v60 }
 0x172   :  { %402 = vperm.xlu1 %1321, %v320_v56   ;;  %v337_v56 = vmul.f32 %v1598_v33, %v197_v60  ;;  %v335_v31 = vmul.f32 %v1588_v28, %v197_v60  ;;  %v338_v33 = vmul.f32 %v1592_v30, %v197_v60  ;;  %v341_v32 = vmul.f32 %v1620_v45, %v197_v60 }
 0x173   :  { %v2130_v28 = vlaneseq  ;;  %v694_v30 = vmul.f32 %v1616_v43, %v1652_v6 }
 0x175   :  { %v1721_v38 = vand.u32 127, %v2130_v28 }
 0x177   :  { %v1730_v41 = vadd.s32 4294967288, %v1721_v38 }
 0x179   :  { %414 = vperm.xlu2 %1322, %v324_v61   ;;  %426 = vperm.xlu0 %1335, %v328_v63   ;;  %v691_v63 = vmul.f32 %v1624_v47, %v1652_v6  ;;  %v700_v47 = vmul.f32 %v1638_v57, %v1652_v6 }
 0x17a   :  { %411 = vperm.xlu1 %1321, %v323_v2   ;;  %v333_v2 = vmul.f32 %v1590_v29, %v197_v60  ;;  %v343_v29 = vmul.f32 %v1600_v21, %v197_v60  ;;  %v688_v21 = vmul.f32 %v1618_v44, %v1652_v6  ;;  %v697_v44 = vmul.f32 %v1622_v46, %v1652_v6 }
 0x17b   :  { %v1740_v60 = vadd.s32 4294967264, %v1721_v38 }
 0x181   :  { %423 = vperm.xlu2 %1322, %v327_v0   ;;  %435 = vperm.xlu0 %1335, %v331_v50   ;;  %v692_v50 = vmul.f32 %v1610_v40, %v1652_v6 }
 0x182   :  { %420 = vperm.xlu1 %1321, %v326_v10  }
 0x189   :  { %432 = vperm.xlu2 %1322, %v330_v1   ;;  %444 = vperm.xlu0 %1335, %v334_v17   ;;  %v693_v1 = vmul.f32 %v1630_v51, %v1652_v6  ;;  %v695_v17 = vmul.f32 %v1632_v52, %v1652_v6 }
 0x18a   :  { %429 = vperm.xlu1 %1321, %v329_v34   ;;  %v1750_v34 = vadd.s32 4294967248, %v1721_v38 }
 0x191   :  { %441 = vperm.xlu2 %1322, %v333_v2   ;;  %453 = vperm.xlu0 %1335, %v337_v56   ;;  %v1752_v2 = vpop.permute.xlu0 %988 }
 0x192   :  { %438 = vperm.xlu1 %1321, %v332_v27   ;;  %v1754_v27 = vpop.permute.xlu1 %670 }
 0x199   :  { %450 = vperm.xlu2 %1322, %v336_v58   ;;  %462 = vperm.xlu0 %1335, %v340_v26   ;;  %v703_v26 = vmul.f32 %v1754_v27, %v1652_v6 }
 0x19a   :  { %447 = vperm.xlu1 %1321, %v335_v31   ;;  %v696_v31 = vmul.f32 %v1634_v55, %v1652_v6 }
 0x1a1   :  { %459 = vperm.xlu2 %1322, %v339_v25   ;;  %471 = vperm.xlu0 %1335, %v343_v29   ;;  %v698_v25 = vmul.f32 %v1644_v16, %v1652_v6  ;;  %v1764_v29 = vadd.s32 4294967280, %v1721_v38 }
 0x1a2   :  { %456 = vperm.xlu1 %1321, %v338_v33   ;;  %v1767_v33 = vadd.s32 4294967224, %v1721_v38 }
 0x1a9   :  { %468 = vperm.xlu2 %1322, %v342_v37   ;;  %756 = vperm.xlu0 %1335, %v689_v42  }
 0x1aa   :  { %465 = vperm.xlu1 %1321, %v341_v32  }
 0x1b1   :  { %753 = vperm.xlu2 %1322, %v688_v21   ;;  %771 = vperm.xlu0 %1335, %v694_v30  }
 0x1b2   :  { %759 = vperm.xlu1 %1321, %v690_v36   ;;  %v699_v36 = vmul.f32 %v1626_v48, %v1652_v6 }
 0x1b3   :  { %v382_v45 = vpop.permute.xlu2 %381 }
 0x1b4   :  { %v477_v10 = vperm.slane %v382_v45, %v1730_v41  ;;  %v706_v45 = vmul.f32 %v1628_v49, %v1654_v9 }
 0x1b9   :  { %762 = vperm.xlu2 %1322, %v691_v63   ;;  %780 = vperm.xlu0 %1335, %v697_v44   ;;  %v701_v63 = vmul.f32 %v1669_v59, %v1652_v6  ;;  %v1783_v44 = vadd.s32 4294967240, %v1721_v38 }
 0x1ba   :  { %765 = vperm.xlu1 %1321, %v692_v50  }
 0x1bb   :  { %v391_v61 = vpop.permute.xlu2 %390 }
 0x1bc   :  { %v489_v0 = vperm.slane %v391_v61, %v1740_v60  ;;  %v1787_v61 = vadd.s32 4294967200, %v1721_v38 }
 0x1c1   :  { %768 = vperm.xlu2 %1322, %v693_v1   ;;  %789 = vperm.xlu0 %1335, %v700_v47  }
 0x1c2   :  { %774 = vperm.xlu1 %1321, %v695_v17  }
 0x1c3   :  { %v397_v56 = vpop.permute.xlu2 %396 }
 0x1c4   :  { %v497_v58 = vperm.slane %v397_v56, %v1750_v34 }
 0x1c9   :  { %777 = vperm.xlu2 %1322, %v696_v31   ;;  %798 = vperm.xlu0 %1335, %v703_v26   ;;  %v709_v26 = vmul.f32 %v1630_v51, %v1654_v9  ;;  %v1802_v31 = vadd.s32 4294967216, %v1721_v38 }
 0x1ca   :  { %783 = vperm.xlu1 %1321, %v698_v25  }
 0x1cb   :  { %v385_v37 = vpop.permute.xlu0 %384  ;;  %v1769_v42 = vpop.permute.xlu2 %405 }
 0x1cc   :  { %v481_v32 = vperm.slane %v385_v37, %v1764_v29  ;;  %v379_v28 = vpop.permute.xlu1 %378  ;;  %v509_v21 = vperm.slane %v1769_v42, %v1767_v33  ;;  %v1806_v37 = vadd.s32 4294967176, %v1721_v38 }
 0x1cd   :  { %v475_v16 = vperm.slane %v379_v28, %v1721_v38 }
 0x1cf   :  { %v479_v30 = vsel %vm478_vm2, %v477_v10, %v475_v16  ;;  %v1790_v10 = vadd.s32 4294967272, %v1721_v38 }
 0x1d0   :  { %v483_v50 = vsel %vm482_vm3, %v481_v32, %v479_v30  ;;  %v1810_v32 = vadd.s32 4294967256, %v1721_v38 }
 0x1d1   :  { %786 = vperm.xlu2 %1322, %v699_v36   ;;  %807 = vperm.xlu0 %1335, %v706_v45   ;;  %v705_v45 = vmul.f32 %v1604_v35, %v1654_v9 }
 0x1d2   :  { %792 = vperm.xlu1 %1321, %v701_v63  }
 0x1d3   :  { %v400_v1 = vpop.permute.xlu0 %399  ;;  %v1792_v47 = vpop.permute.xlu2 %414 }
 0x1d4   :  { %v501_v49 = vperm.slane %v400_v1, %v1783_v44  ;;  %v388_v6 = vpop.permute.xlu1 %387  ;;  %v521_v59 = vperm.slane %v1792_v47, %v1787_v61  ;;  %v1829_v1 = vadd.s32 4294967232, %v1721_v38 }
 0x1d5   :  { %v485_v17 = vperm.slane %v388_v6, %v1790_v10 }
 0x1d7   :  { %v487_v56 = vsel %vm486_vm4, %v485_v17, %v483_v50  ;;  %v1826_v50 = vadd.s32 4294967192, %v1721_v38 }
 0x1d8   :  { %v491_v25 = vsel %vm490_vm5, %v489_v0, %v487_v56 }
 0x1d9   :  { %795 = vperm.xlu2 %1322, %v1659_v24   ;;  %816 = vperm.xlu0 %1335, %v709_v26  }
 0x1da   :  { %801 = vperm.xlu1 %1321, %v1663_v53   ;;  %v712_v53 = vmul.f32 %v1634_v55, %v1654_v9 }
 0x1db   :  { %v409_v28 = vpop.permute.xlu0 %408  ;;  %v1813_v16 = vpop.permute.xlu2 %423 }
 0x1dc   :  { %v513_v51 = vperm.slane %v409_v28, %v1802_v31  ;;  %v394_v30 = vpop.permute.xlu1 %393  ;;  %v533_v0 = vperm.slane %v1813_v16, %v1806_v37  ;;  %v710_v28 = vmul.f32 %v1616_v43, %v1654_v9  ;;  %v1848_v16 = vadd.s32 4294967208, %v1721_v38 }
 0x1dd   :  { %v493_v36 = vperm.slane %v394_v30, %v1810_v32 }
 0x1df   :  { %v495_v24 = vsel %vm494_vm6, %v493_v36, %v491_v25  ;;  %v708_v25 = vmul.f32 %v1610_v40, %v1654_v9 }
 0x1e0   :  { %v499_v63 = vsel %vm498_vm7, %v497_v58, %v495_v24 }
 0x1e1   :  { %804 = vperm.xlu2 %1322, %v705_v45   ;;  %825 = vperm.xlu0 %1335, %v712_v53   ;;  %v503_v47 = vsel %vm502_vm8, %v501_v49, %v499_v63  ;;  %v711_v45 = vmul.f32 %v1632_v52, %v1654_v9  ;;  %v713_v53 = vmul.f32 %v1622_v46, %v1654_v9  ;;  %v1862_v63 = vadd.s32 4294967184, %v1721_v38 }
 0x1e2   :  { %810 = vperm.xlu1 %1321, %v1667_v54   ;;  %v715_v54 = vmul.f32 %v1626_v48, %v1654_v9 }
 0x1e3   :  { %v418_v6 = vpop.permute.xlu0 %417  ;;  %v433_v17 = vpop.permute.xlu2 %432 }
 0x1e4   :  { %v525_v35 = vperm.slane %v418_v6, %v1826_v50  ;;  %v403_v55 = vpop.permute.xlu1 %402  ;;  %v539_v58 = vperm.slane %v433_v17, %v1764_v29 }
 0x1e5   :  { %v505_v56 = vperm.slane %v403_v55, %v1829_v1 }
 0x1e7   :  { %v507_v26 = vsel %vm506_vm9, %v505_v56, %v503_v47 }
 0x1e8   :  { %v511_v49 = vsel %vm510_vm10, %v509_v21, %v507_v26 }
 0x1e9   :  { %813 = vperm.xlu2 %1322, %v708_v25   ;;  %834 = vperm.xlu0 %1335, %v715_v54   ;;  %v515_v30 = vsel %vm514_vm11, %v513_v51, %v511_v49 }
 0x1ea   :  { %819 = vperm.xlu1 %1321, %v710_v28  }
 0x1eb   :  { %v427_v40 = vpop.permute.xlu0 %426  ;;  %v442_v36 = vpop.permute.xlu2 %441 }
 0x1ec   :  { %v412_v48 = vpop.permute.xlu1 %411  ;;  %v536_v24 = vperm.slane %v427_v40, %v1721_v38  ;;  %v545_v42 = vperm.slane %v442_v36, %v1810_v32 }
 0x1ed   :  { %v517_v21 = vperm.slane %v412_v48, %v1848_v16 }
 0x1ef   :  { %v519_v43 = vsel %vm518_vm12, %v517_v21, %v515_v30 }
 0x1f0   :  { %v523_v51 = vsel %vm522_vm13, %v521_v59, %v519_v43 }
 0x1f1   :  { %822 = vperm.xlu2 %1322, %v711_v45   ;;  %843 = vperm.xlu0 %1335, %v1674_v62   ;;  %v527_v47 = vsel %vm526_vm14, %v525_v35, %v523_v51  ;;  %v716_v35 = vmul.f32 %v1638_v57, %v1654_v9 }
 0x1f2   :  { %828 = vperm.xlu1 %1321, %v713_v53  }
 0x1f3   :  { %v436_v6 = vpop.permute.xlu0 %435  ;;  %v451_v17 = vpop.permute.xlu2 %450 }
 0x1f4   :  { %v421_v55 = vpop.permute.xlu1 %420  ;;  %v541_v52 = vperm.slane %v436_v6, %v1790_v10  ;;  %v551_v59 = vperm.slane %v451_v17, %v1829_v1 }
 0x1f5   :  { %v529_v46 = vperm.slane %v421_v55, %v1862_v63 }
 0x1f7   :  { %v531_v56 = vsel %vm530_vm15, %v529_v46, %v527_v47 }
 0x1f8   :  { %v1870_v62 = vsel %vm534_vm0, %v533_v0, %v531_v56  ;;  %v719_v0 = vmul.f32 %v1754_v27, %v1654_v9 }
 0x1f9   :  { %831 = vperm.xlu2 %1322, %v1681_v5  }
 0x1fa   :  { %837 = vperm.xlu1 %1321, %v716_v35  }
 0x1fb   :  { %v445_v26 = vpop.permute.xlu0 %444  ;;  %v460_v25 = vpop.permute.xlu2 %459 }
 0x1fc   :  { %v430_v54 = vpop.permute.xlu1 %429  ;;  %v547_v49 = vperm.slane %v445_v26, %v1750_v34  ;;  %v557_v28 = vperm.slane %v460_v25, %v1848_v16 }
 0x1fd   :  { %v537_v30 = vperm.slane %v430_v54, %v1730_v41 }
 0x1ff   :  { %v538_v40 = vsel %vm478_vm2, %v537_v30, %v536_v24 }
 0x200   :  { %v540_v36 = vsel %vm482_vm3, %v539_v58, %v538_v40 }
 0x201   :  { %840 = vperm.xlu2 %1322, %v1685_v22   ;;  %v542_v57 = vsel %vm486_vm4, %v541_v52, %v540_v36 }
 0x202   :  { %846 = vperm.xlu1 %1321, %v719_v0  }
 0x203   :  { %v454_v5 = vpop.permute.xlu0 %453  ;;  %v469_v48 = vpop.permute.xlu2 %468 }
 0x204   :  { %v439_v21 = vpop.permute.xlu1 %438  ;;  %v553_v43 = vperm.slane %v454_v5, %v1767_v33  ;;  %v563_v45 = vperm.slane %v469_v48, %v1862_v63 }
 0x205   :  { %v543_v51 = vperm.slane %v439_v21, %v1740_v60 }
 0x207   :  { %v544_v24 = vsel %vm490_vm5, %v543_v51, %v542_v57 }
 0x208   :  { %v546_v9 = vsel %vm494_vm6, %v545_v42, %v544_v24 }
 0x209   :  { %1323 = vset.pattern.permute.xlu2 %v1423_v3  ;;  %v548_v22 = vsel %vm498_vm7, %v547_v49, %v546_v9 }
 0x20a   :  { %1325 = vset.pattern.permute.xlu1 %v1426_v4 }
 0x20b   :  { %v463_v27 = vpop.permute.xlu0 %462  ;;  %v754_v58 = vpop.permute.xlu2 %753 }
 0x20c   :  { %v448_v53 = vpop.permute.xlu1 %447  ;;  %v559_v47 = vperm.slane %v463_v27, %v1787_v61  ;;  %v848_v6 = vperm.slane %v754_v58, %v1721_v38 }
 0x20d   :  { %v549_v17 = vperm.slane %v448_v53, %v1783_v44 }
 0x20f   :  { %v550_v55 = vsel %vm502_vm8, %v549_v17, %v548_v22 }
 0x210   :  { %v552_v52 = vsel %vm506_vm9, %v551_v59, %v550_v55 }
 0x211   :  { %922 = vperm.xlu2 %1323, %v1556_v7   ;;  %v554_v3 = vsel %vm510_vm10, %v553_v43, %v552_v52 }
 0x212   :  { %934 = vperm.xlu1 %1325, %v1556_v7  }
 0x213   :  { %v472_v4 = vpop.permute.xlu0 %471  ;;  %v763_v42 = vpop.permute.xlu2 %762 }
 0x214   :  { %v457_v46 = vpop.permute.xlu1 %456  ;;  %v565_v56 = vperm.slane %v472_v4, %v1806_v37  ;;  %v853_v35 = vperm.slane %v763_v42, %v1790_v10 }
 0x215   :  { %v555_v26 = vperm.slane %v457_v46, %v1802_v31 }
 0x217   :  { %v556_v25 = vsel %vm514_vm11, %v555_v26, %v554_v3 }
 0x218   :  { %v558_v54 = vsel %vm518_vm12, %v557_v28, %v556_v25 }
 0x219   :  { %1326 = vset.pattern.permute.xlu2 %v1450_v11  ;;  %v560_v59 = vsel %vm522_vm13, %v559_v47, %v558_v54 }
 0x21a   :  { %1327 = vset.pattern.permute.xlu1 %v1466_v15 }
 0x21b   :  { %v757_v49 = vpop.permute.xlu0 %756  ;;  %v769_v30 = vpop.permute.xlu2 %768 }
 0x21c   :  { %v466_v40 = vpop.permute.xlu1 %465  ;;  %v849_v0 = vperm.slane %v757_v49, %v1730_v41  ;;  %v857_v36 = vperm.slane %v769_v30, %v1810_v32 }
 0x21d   :  { %v561_v57 = vperm.slane %v466_v40, %v1826_v50 }
 0x21e   :  { %v850_v5 = vsel %vm478_vm2, %v849_v0, %v848_v6 }
 0x21f   :  { %v562_v48 = vsel %vm526_vm14, %v561_v57, %v560_v59 }
 0x220   :  { %v564_v11 = vsel %vm530_vm15, %v563_v45, %v562_v48 }
 0x221   :  { %940 = vperm.xlu2 %1326, %v1556_v7   ;;  %v566_v15 = vsel %vm534_vm0, %v565_v56, %v564_v11 }
 0x222   :  { %946 = vperm.xlu1 %1327, %v1556_v7   ;;  %v1919_v28 = vsel %vm567_vm1, %v566_v15, %v1870_v62 }
 0x223   :  { %v772_v21 = vpop.permute.xlu0 %771  ;;  %v778_v43 = vpop.permute.xlu2 %777 }
 0x224   :  { %v760_v51 = vpop.permute.xlu1 %759  ;;  %v859_v24 = vperm.slane %v772_v21, %v1750_v34  ;;  %v863_v9 = vperm.slane %v778_v43, %v1829_v1 }
 0x225   :  { %v851_v22 = vperm.slane %v760_v51, %v1764_v29 }
 0x227   :  { %v852_v45 = vsel %vm482_vm3, %v851_v22, %v850_v5 }
 0x228   :  { %v854_v27 = vsel %vm486_vm4, %v853_v35, %v852_v45 }
 0x229   :  { %1328 = vset.pattern.permute.xlu2 %v1459_v13 }
 0x22a   :  { %1330 = vset.pattern.permute.xlu1 %v1440_v8 }
 0x22b   :  { %v781_v58 = vpop.permute.xlu0 %780  ;;  %v787_v62 = vpop.permute.xlu2 %786 }
 0x22c   :  { %v766_v53 = vpop.permute.xlu1 %765  ;;  %v865_v47 = vperm.slane %v781_v58, %v1767_v33  ;;  %v869_v6 = vperm.slane %v787_v62, %v1848_v16 }
 0x22d   :  { %v855_v17 = vperm.slane %v766_v53, %v1740_v60 }
 0x22f   :  { %v856_v55 = vsel %vm490_vm5, %v855_v17, %v854_v27 }
 0x230   :  { %v858_v52 = vsel %vm494_vm6, %v857_v36, %v856_v55 }
 0x231   :  { %952 = vperm.xlu2 %1328, %v1556_v7   ;;  %v860_v3 = vsel %vm498_vm7, %v859_v24, %v858_v52 }
 0x232   :  { %964 = vperm.xlu1 %1330, %v1556_v7  }
 0x233   :  { %v790_v8 = vpop.permute.xlu0 %789  ;;  %v796_v13 = vpop.permute.xlu2 %795 }
 0x234   :  { %v775_v4 = vpop.permute.xlu1 %774  ;;  %v871_v42 = vperm.slane %v790_v8, %v1787_v61  ;;  %v875_v46 = vperm.slane %v796_v13, %v1862_v63 }
 0x235   :  { %v861_v56 = vperm.slane %v775_v4, %v1783_v44 }
 0x237   :  { %v862_v35 = vsel %vm502_vm8, %v861_v56, %v860_v3 }
 0x238   :  { %v864_v26 = vsel %vm506_vm9, %v863_v9, %v862_v35 }
 0x239   :  { %1331 = vset.pattern.permute.xlu2 %v1478_v18  ;;  %v866_v25 = vsel %vm510_vm10, %v865_v47, %v864_v26 }
 0x23a   :  { %1332 = vset.pattern.permute.xlu1 %v1483_v19 }
 0x23b   :  { %v799_v54 = vpop.permute.xlu0 %798  ;;  %v805_v59 = vpop.permute.xlu2 %804 }
 0x23c   :  { %v784_v49 = vpop.permute.xlu1 %783  ;;  %v877_v30 = vperm.slane %v799_v54, %v1806_v37  ;;  %v880_v40 = vperm.slane %v805_v59, %v1730_v41  ;;  %v2131_v59 = vld [vmem:[#allocation9_spill] sm:$0xff] }
 0x23d   :  { %v867_v0 = vperm.slane %v784_v49, %v1802_v31  ;;  %v1984_v49 = vperm.slane %v2131_v59, 2 }
 0x23f   :  { %v868_v36 = vsel %vm514_vm11, %v867_v0, %v866_v25 }
 0x240   :  { %v870_v57 = vsel %vm518_vm12, %v869_v6, %v868_v36  ;;  %v2132_v36 = vld [vmem:[#allocation8_spill] sm:$0xff] }
 0x241   :  { %970 = vperm.xlu2 %1331, %v1556_v7   ;;  %v872_v18 = vsel %vm522_vm13, %v871_v42, %v870_v57  ;;  %v1031_v57 = vmul.f32 %v1646_v39, %v1984_v49 }
 0x242   :  { %976 = vperm.xlu1 %1332, %v1556_v7  }
 0x243   :  { %v808_v19 = vpop.permute.xlu0 %807  ;;  %v814_v5 = vpop.permute.xlu2 %813 }
 0x244   :  { %v793_v48 = vpop.permute.xlu1 %792  ;;  %v882_v11 = vperm.slane %v808_v19, %v1764_v29  ;;  %v886_v15 = vperm.slane %v814_v5, %v1740_v60  ;;  %v2133_v19 = vmov 0  }
 0x245   :  { %v873_v21 = vperm.slane %v793_v48, %v1826_v50 }
 0x247   :  { %v874_v43 = vsel %vm526_vm14, %v873_v21, %v872_v18  ;;  %v2134_v21 = vld [vmem:[#allocation10_spill] sm:$0xff] }
 0x248   :  { %v876_v51 = vsel %vm530_vm15, %v875_v46, %v874_v43 }
 0x249   :  { %1333 = vset.pattern.permute.xlu2 %v1454_v12  ;;  %v878_v24 = vsel %vm534_vm0, %v877_v30, %v876_v51 }
 0x24a   :  { %1336 = vset.pattern.permute.xlu1 %v1463_v14 }
 0x24b   :  { %v817_v9 = vpop.permute.xlu0 %816  ;;  %v823_v22 = vpop.permute.xlu2 %822 }
 0x24c   :  { %v802_v45 = vpop.permute.xlu1 %801  ;;  %v888_v27 = vperm.slane %v817_v9, %v1810_v32  ;;  %v892_v58 = vperm.slane %v823_v22, %v1783_v44 }
 0x24d   :  { %v879_v62 = vperm.slane %v802_v45, %v1721_v38 }
 0x24f   :  { %v881_v53 = vsel %vm478_vm2, %v880_v40, %v879_v62 }
 0x250   :  { %v883_v47 = vsel %vm482_vm3, %v882_v11, %v881_v53 }
 0x251   :  { %982 = vperm.xlu2 %1333, %v1556_v7  }
 0x252   :  { %994 = vperm.xlu1 %1336, %v1556_v7  }
 0x253   :  { %v826_v12 = vpop.permute.xlu0 %825  ;;  %v832_v6 = vpop.permute.xlu2 %831 }
 0x254   :  { %v811_v14 = vpop.permute.xlu1 %810  ;;  %v894_v17 = vperm.slane %v826_v12, %v1829_v1  ;;  %v898_v55 = vperm.slane %v832_v6, %v1802_v31 }
 0x255   :  { %v884_v52 = vperm.slane %v811_v14, %v1790_v10 }
 0x257   :  { %v885_v3 = vsel %vm486_vm4, %v884_v52, %v883_v47  ;;  %v2135_v52 = vld [vmem:[#allocation11_spill] sm:$0xff] }
 0x258   :  { %v887_v8 = vsel %vm490_vm5, %v886_v15, %v885_v3  ;;  %v1036_v3 = vmul.f32 %v2135_v52, %v1984_v49 }
 0x259   :  { %1337 = vset.pattern.permute.xlu2 %v1487_v20  ;;  %v889_v13 = vsel %vm494_vm6, %v888_v27, %v887_v8  ;;  %v1345_v27 = vld [vmem:[%s2114_s3 + $0x3] ss:$0 sm:$0xff]  ;;  %s1388_s3 = smov [#allocation5]  }
 0x25a   :  { %1338 = vset.pattern.permute.xlu1 %v1505_v23  ;;  %v570_v47 = vadd.f32 %v1345_v27, %v1919_v28  ;;  %s1261_s19 = sshll.u32 %s1388_s3, 4  ;;  %s1262_s19 = int_to_ptr.vmem [resolvable:$true] %s1261_s19 }
 0x25b   :  { %v835_v4 = vpop.permute.xlu0 %834  ;;  %v841_v42 = vpop.permute.xlu2 %840 }
 0x25c   :  { %v820_v46 = vpop.permute.xlu1 %819  ;;  %v900_v56 = vperm.slane %v835_v4, %v1848_v16  ;;  %v904_v35 = vperm.slane %v841_v42, %v1826_v50 }
 0x25d   :  { %v890_v26 = vperm.slane %v820_v46, %v1750_v34 }
 0x25f   :  { %v891_v25 = vsel %vm498_vm7, %v890_v26, %v889_v13 }
 0x260   :  { %v893_v54 = vsel %vm502_vm8, %v892_v58, %v891_v25 }
 0x261   :  { %1000 = vperm.xlu2 %1337, %v1556_v7   ;;  %v895_v20 = vsel %vm506_vm9, %v894_v17, %v893_v54  ;;  %v1041_v54 = vmul.f32 %v1752_v2, %v1984_v49 }
 0x262   :  { %1006 = vperm.xlu1 %1338, %v1556_v7  }
 0x263   :  { %v844_v48 = vpop.permute.xlu0 %843 }
 0x264   :  { %v829_v23 = vpop.permute.xlu1 %828  ;;  %v906_v9 = vperm.slane %v844_v48, %v1862_v63 }
 0x265   :  { %v896_v30 = vperm.slane %v829_v23, %v1767_v33 }
 0x267   :  { %v897_v40 = vsel %vm510_vm10, %v896_v30, %v895_v20 }
 0x268   :  { %v899_v0 = vsel %vm514_vm11, %v898_v55, %v897_v40 }
 0x269   :  { %1339 = vset.pattern.permute.xlu2 %v2132_v36  ;;  %v901_v18 = vsel %vm518_vm12, %v900_v56, %v899_v0 }
 0x26a   :  { %1340 = vset.pattern.permute.xlu1 %v2133_v19 }
 0x26b   :  { %1098 = vperm.xlu1 %1340, %v1031_v57   ;;  %v923_v5 = vpop.permute.xlu2 %922 }
 0x26c   :  { %v838_v11 = vpop.permute.xlu1 %837  ;;  %v1030_v15 = vmul.f32 %v923_v5, %v1984_v49  ;;  %v1046_v43 = vmul.f32 %v923_v5, %v2134_v21 }
 0x26d   :  { %v902_v51 = vperm.slane %v838_v11, %v1787_v61 }
 0x26e   :  { %1095 = vperm.xlu0 %1335, %v1030_v15  }
 0x26f   :  { %v903_v22 = vsel %vm522_vm13, %v902_v51, %v901_v18 }
 0x270   :  { %v905_v39 = vsel %vm526_vm14, %v904_v35, %v903_v22 }
 0x271   :  { %1012 = vperm.xlu2 %1339, %v1556_v7   ;;  %v907_v45 = vsel %vm530_vm15, %v906_v9, %v905_v39  ;;  %v2136_v39 = vld [vmem:[#allocation12_spill] sm:$0xff] }
 0x274   :  { %v847_v58 = vpop.permute.xlu1 %846 }
 0x275   :  { %v908_v62 = vperm.slane %v847_v58, %v1806_v37 }
 0x277   :  { %v909_v53 = vsel %vm534_vm0, %v908_v62, %v907_v45 }
 0x278   :  { %v910_v12 = vsel %vm567_vm1, %v909_v53, %v878_v24 }
 0x279   :  { %1341 = vset.pattern.permute.xlu2 %v2133_v19  ;;  %v2010_v6 = vadd.f32 %v910_v12, %v570_v47 }
 0x27b   :  { %v941_v7 = vpop.permute.xlu2 %940 }
 0x27c   :  { %v1033_v14 = vmul.f32 %v941_v7, %v1984_v49  ;;  %v1049_v17 = vmul.f32 %v941_v7, %v2134_v21 }
 0x27e   :  { %1104 = vperm.xlu1 %1340, %v1033_v14  }
 0x284   :  { %v935_v55 = vpop.permute.xlu1 %934 }
 0x285   :  { %v1032_v8 = vmul.f32 %v935_v55, %v1984_v49  ;;  %v1048_v28 = vmul.f32 %v935_v55, %v2134_v21  ;;  %v1057_v55 = vmul.f32 %v1752_v2, %v2134_v21 }
 0x286   :  { %1113 = vperm.xlu1 %1340, %v1036_v3  }
 0x287   :  { %1101 = vperm.xlu2 %1341, %v1032_v8  }
 0x28b   :  { %v953_v24 = vpop.permute.xlu2 %952 }
 0x28c   :  { %v1035_v13 = vmul.f32 %v953_v24, %v1984_v49  ;;  %v1051_v4 = vmul.f32 %v953_v24, %v2134_v21 }
 0x28e   :  { %1110 = vperm.xlu0 %1335, %v1035_v13  }
 0x294   :  { %v947_v42 = vpop.permute.xlu1 %946 }
 0x295   :  { %v1034_v46 = vmul.f32 %v947_v42, %v1984_v49  ;;  %v1050_v56 = vmul.f32 %v947_v42, %v2134_v21 }
 0x297   :  { %1107 = vperm.xlu2 %1341, %v1034_v46  }
 0x29b   :  { %v971_v35 = vpop.permute.xlu2 %970 }
 0x29c   :  { %v1038_v26 = vmul.f32 %v971_v35, %v1984_v49  ;;  %v1054_v25 = vmul.f32 %v971_v35, %v2134_v21 }
 0x29e   :  { %1119 = vperm.xlu0 %1335, %v1038_v26  }
 0x2a4   :  { %v965_v20 = vpop.permute.xlu1 %964 }
 0x2a5   :  { %v1037_v23 = vmul.f32 %v965_v20, %v1984_v49  ;;  %v1053_v59 = vmul.f32 %v965_v20, %v2134_v21 }
 0x2a6   :  { %1128 = vperm.xlu0 %1335, %v1041_v54  }
 0x2a7   :  { %1116 = vperm.xlu2 %1341, %v1037_v23  }
 0x2ab   :  { %v983_v30 = vpop.permute.xlu2 %982 }
 0x2ac   :  { %v1040_v40 = vmul.f32 %v983_v30, %v1984_v49  ;;  %v1056_v0 = vmul.f32 %v983_v30, %v2134_v21 }
 0x2af   :  { %1125 = vperm.xlu2 %1341, %v1040_v40  }
 0x2b4   :  { %v977_v36 = vpop.permute.xlu1 %976 }
 0x2b5   :  { %v1039_v57 = vmul.f32 %v977_v36, %v1984_v49  ;;  %v1055_v45 = vmul.f32 %v977_v36, %v2134_v21 }
 0x2b7   :  { %1122 = vperm.xlu1 %1340, %v1039_v57  }
 0x2bb   :  { %v1001_v18 = vpop.permute.xlu2 %1000 }
 0x2bc   :  { %v1043_v19 = vmul.f32 %v1001_v18, %v1984_v49  ;;  %v1059_v5 = vmul.f32 %v1001_v18, %v2134_v21 }
 0x2be   :  { %1134 = vperm.xlu2 %1341, %v1043_v19  }
 0x2c4   :  { %v995_v48 = vpop.permute.xlu1 %994 }
 0x2c5   :  { %v1042_v11 = vmul.f32 %v995_v48, %v1984_v49  ;;  %v1058_v7 = vmul.f32 %v995_v48, %v2134_v21 }
 0x2c6   :  { %1143 = vperm.xlu2 %1341, %v1046_v43   ;;  %v2137_v43 = vld [vmem:[#allocation13_spill] sm:$0xff] }
 0x2c7   :  { %1131 = vperm.xlu1 %1340, %v1042_v11  }
 0x2cb   :  { %v1013_v15 = vpop.permute.xlu2 %1012 }
 0x2cc   :  { %v1045_v51 = vmul.f32 %v1013_v15, %v1984_v49 }
 0x2ce   :  { %1152 = vperm.xlu2 %1341, %v1049_v17   ;;  %v1061_v17 = vmul.f32 %v1013_v15, %v2134_v21 }
 0x2cf   :  { %1140 = vperm.xlu1 %1340, %v1045_v51  }
 0x2d4   :  { %v1007_v9 = vpop.permute.xlu1 %1006 }
 0x2d5   :  { %v1044_v22 = vmul.f32 %v1007_v9, %v1984_v49 }
 0x2d6   :  { %1161 = vperm.xlu2 %1341, %v2136_v39  }
 0x2d7   :  { %1137 = vperm.xlu0 %1335, %v1044_v22   ;;  %1149 = vperm.xlu1 %1340, %v1048_v28  }
 0x2dd   :  { %v1099_v27 = vpop.permute.xlu1 %1098 }
 0x2de   :  { %v1191_v58 = vperm.slane %v1099_v27, %v1730_v41  ;;  %1170 = vperm.xlu2 %1341, %v1055_v45  }
 0x2df   :  { %1146 = vperm.xlu0 %1335, %v2137_v43   ;;  %1158 = vperm.xlu1 %1340, %v1051_v4   ;;  %v1060_v4 = vmul.f32 %v1007_v9, %v2134_v21 }
 0x2e0   :  { %v1096_v62 = vpop.permute.xlu0 %1095 }
 0x2e1   :  { %v1190_v53 = vperm.slane %v1096_v62, %v1721_v38  ;;  %v1102_v47 = vpop.permute.xlu2 %1101 }
 0x2e2   :  { %v1193_v12 = vperm.slane %v1102_v47, %v1764_v29 }
 0x2e3   :  { %v1192_v49 = vsel %vm478_vm2, %v1191_v58, %v1190_v53 }
 0x2e4   :  { %v1194_v14 = vsel %vm482_vm3, %v1193_v12, %v1192_v49 }
 0x2e6   :  { %1179 = vperm.xlu2 %1341, %v1058_v7  }
 0x2e7   :  { %1155 = vperm.xlu0 %1335, %v1050_v56   ;;  %1167 = vperm.xlu1 %1340, %v1054_v25  }
 0x2ee   :  { %1188 = vperm.xlu2 %1341, %v1061_v17  }
 0x2ef   :  { %1164 = vperm.xlu0 %1335, %v1053_v59   ;;  %1176 = vperm.xlu1 %1340, %v1057_v55  }
 0x2f0   :  { %v1105_v52 = vpop.permute.xlu1 %1104 }
 0x2f1   :  { %v1195_v3 = vperm.slane %v1105_v52, %v1790_v10  ;;  %v1108_v8 = vpop.permute.xlu2 %1107 }
 0x2f2   :  { %v1197_v28 = vperm.slane %v1108_v8, %v1740_v60 }
 0x2f3   :  { %v1196_v24 = vsel %vm486_vm4, %v1195_v3, %v1194_v14 }
 0x2f4   :  { %v1198_v13 = vsel %vm490_vm5, %v1197_v28, %v1196_v24 }
 0x2f7   :  { %1173 = vperm.xlu0 %1335, %v1056_v0   ;;  %1185 = vperm.xlu1 %1340, %v1060_v4  }
 0x2f8   :  { %v1114_v42 = vpop.permute.xlu1 %1113 }
 0x2f9   :  { %v1201_v35 = vperm.slane %v1114_v42, %v1750_v34 }
 0x2ff   :  { %1182 = vperm.xlu0 %1335, %v1059_v5  }
 0x300   :  { %v1111_v2 = vpop.permute.xlu0 %1110 }
 0x301   :  { %v1199_v46 = vperm.slane %v1111_v2, %v1810_v32  ;;  %v1117_v56 = vpop.permute.xlu2 %1116 }
 0x302   :  { %v1203_v25 = vperm.slane %v1117_v56, %v1783_v44 }
 0x303   :  { %v1200_v26 = vsel %vm494_vm6, %v1199_v46, %v1198_v13 }
 0x304   :  { %v1202_v54 = vsel %vm498_vm7, %v1201_v35, %v1200_v26 }
 0x305   :  { %v1204_v20 = vsel %vm502_vm8, %v1203_v25, %v1202_v54 }
 0x309   :  { %v1126_v30 = vpop.permute.xlu2 %1125 }
 0x30a   :  { %v1209_v57 = vperm.slane %v1126_v30, %v1802_v31 }
 0x310   :  { %v1120_v23 = vpop.permute.xlu0 %1119 }
 0x311   :  { %v1205_v21 = vperm.slane %v1120_v23, %v1829_v1 }
 0x313   :  { %v1206_v59 = vsel %vm506_vm9, %v1205_v21, %v1204_v20 }
 0x318   :  { %v1129_v40 = vpop.permute.xlu0 %1128  ;;  %v1135_v11 = vpop.permute.xlu2 %1134 }
 0x319   :  { %v1211_v18 = vperm.slane %v1129_v40, %v1848_v16  ;;  %v1215_v9 = vperm.slane %v1135_v11, %v1826_v50 }
 0x320   :  { %v1144_v45 = vpop.permute.xlu2 %1143 }
 0x321   :  { %v1221_v52 = vperm.slane %v1144_v45, %v1721_v38 }
 0x328   :  { %v1153_v58 = vpop.permute.xlu2 %1152 }
 0x329   :  { %v1123_v0 = vpop.permute.xlu1 %1122  ;;  %v1226_v4 = vperm.slane %v1153_v58, %v1790_v10 }
 0x32a   :  { %v1207_v36 = vperm.slane %v1123_v0, %v1767_v33 }
 0x32c   :  { %v1208_v19 = vsel %vm510_vm10, %v1207_v36, %v1206_v59 }
 0x32d   :  { %v1210_v5 = vsel %vm514_vm11, %v1209_v57, %v1208_v19 }
 0x32e   :  { %v1212_v48 = vsel %vm518_vm12, %v1211_v18, %v1210_v5 }
 0x330   :  { %v1162_v17 = vpop.permute.xlu2 %1161 }
 0x331   :  { %v1232_v26 = vperm.slane %v1162_v17, %v1750_v34 }
 0x338   :  { %v1171_v2 = vpop.permute.xlu2 %1170 }
 0x339   :  { %v1132_v15 = vpop.permute.xlu1 %1131 }
 0x33a   :  { %v1213_v51 = vperm.slane %v1132_v15, %v1787_v61 }
 0x33c   :  { %v1214_v22 = vsel %vm522_vm13, %v1213_v51, %v1212_v48 }
 0x33d   :  { %v1216_v39 = vsel %vm526_vm14, %v1215_v9, %v1214_v22 }
 0x340   :  { %v1180_v54 = vpop.permute.xlu2 %1179 }
 0x341   :  { %v1141_v27 = vpop.permute.xlu1 %1140  ;;  %v1244_v36 = vperm.slane %v1180_v54, %v1787_v61 }
 0x342   :  { %v1219_v47 = vperm.slane %v1141_v27, %v1806_v37 }
 0x348   :  { %v1189_v57 = vpop.permute.xlu2 %1188 }
 0x349   :  { %v1138_v43 = vpop.permute.xlu0 %1137  ;;  %v1150_v62 = vpop.permute.xlu1 %1149 }
 0x34a   :  { %v1217_v53 = vperm.slane %v1138_v43, %v1862_v63  ;;  %v1224_v8 = vperm.slane %v1150_v62, %v1764_v29 }
 0x34c   :  { %v1218_v12 = vsel %vm530_vm15, %v1217_v53, %v1216_v39 }
 0x34d   :  { %v1220_v49 = vsel %vm534_vm0, %v1219_v47, %v1218_v12 }
 0x351   :  { %v1147_v7 = vpop.permute.xlu0 %1146  ;;  %v1159_v14 = vpop.permute.xlu1 %1158 }
 0x352   :  { %v1222_v55 = vperm.slane %v1147_v7, %v1730_v41  ;;  %v1230_v41 = vperm.slane %v1159_v14, %v1810_v32  ;;  %v1238_v32 = vperm.slane %v1171_v2, %v1767_v33 }
 0x354   :  { %v1223_v3 = vsel %vm478_vm2, %v1222_v55, %v1221_v52 }
 0x355   :  { %v1225_v24 = vsel %vm482_vm3, %v1224_v8, %v1223_v3 }
 0x356   :  { %v1227_v46 = vsel %vm486_vm4, %v1226_v4, %v1225_v24 }
 0x359   :  { %v1156_v28 = vpop.permute.xlu0 %1155  ;;  %v1168_v42 = vpop.permute.xlu1 %1167 }
 0x35a   :  { %v1228_v13 = vperm.slane %v1156_v28, %v1740_v60  ;;  %v1236_v20 = vperm.slane %v1168_v42, %v1829_v1 }
 0x35c   :  { %v1229_v56 = vsel %vm490_vm5, %v1228_v13, %v1227_v46 }
 0x35d   :  { %v1231_v35 = vsel %vm494_vm6, %v1230_v41, %v1229_v56 }
 0x35e   :  { %v1233_v25 = vsel %vm498_vm7, %v1232_v26, %v1231_v35 }
 0x361   :  { %v1165_v38 = vpop.permute.xlu0 %1164  ;;  %v1177_v10 = vpop.permute.xlu1 %1176 }
 0x362   :  { %v1234_v29 = vperm.slane %v1165_v38, %v1783_v44  ;;  %v1242_v34 = vperm.slane %v1177_v10, %v1848_v16 }
 0x364   :  { %v1235_v60 = vsel %vm502_vm8, %v1234_v29, %v1233_v25 }
 0x365   :  { %v1237_v23 = vsel %vm506_vm9, %v1236_v20, %v1235_v60 }
 0x366   :  { %v1239_v30 = vsel %vm510_vm10, %v1238_v32, %v1237_v23 }
 0x369   :  { %v1174_v21 = vpop.permute.xlu0 %1173  ;;  %v1186_v0 = vpop.permute.xlu1 %1185 }
 0x36a   :  { %v1240_v59 = vperm.slane %v1174_v21, %v1802_v31  ;;  %v1248_v19 = vperm.slane %v1186_v0, %v1862_v63  ;;  %v1250_v31 = vperm.slane %v1189_v57, %v1806_v37 }
 0x36c   :  { %v1241_v44 = vsel %vm514_vm11, %v1240_v59, %v1239_v30 }
 0x36d   :  { %v1243_v40 = vsel %vm518_vm12, %v1242_v34, %v1241_v44 }
 0x36e   :  { %v1245_v33 = vsel %vm522_vm13, %v1244_v36, %v1243_v40 }
 0x371   :  { %v1183_v1 = vpop.permute.xlu0 %1182 }
 0x372   :  { %v1246_v18 = vperm.slane %v1183_v1, %v1826_v50 }
 0x374   :  { %v1247_v5 = vsel %vm526_vm14, %v1246_v18, %v1245_v33 }
 0x375   :  { %v1249_v48 = vsel %vm530_vm15, %v1248_v19, %v1247_v5 }
 0x376   :  { %v1251_v61 = vsel %vm534_vm0, %v1250_v31, %v1249_v48 }
 0x377   :  { %v1252_v50 = vsel %vm567_vm1, %v1251_v61, %v1220_v49 }
 0x378   :  { %v1254_v16 = vadd.f32 %v1252_v50, %v2010_v6 }
 0x37a   :  { %1255 = vst [vmem:[#allocation5] sm:$0x3] %v1254_v16 }
 0x37b   :  { %1266 = dma.vmem_to_hbm [thread:$0]  %s1262_s19, 32, %s1264_s21, [#allocation3]  }
 0x37c   :  { %1384 = dma.done.wait [#allocation3], 32  }
 0x37d   :  { %1385 = vsyncadd [#allocation3], 4294967264 }
 0x37e   :  { %1271 = vsyncpa [#allocation3], 1 }
 0x37f   :  { %1272 = vsyncpa [#allocation4], 1 }

</bundles_post_ra>
